<compile_context>
chip_gen: v7x
topology: tpu7x:2x2x1
jax: 0.10.0
libtpu: 0.0.40
codegen_flags: <defaults>
</compile_context>

<pallas_src>
import functools

import jax
import jax.numpy as jnp
from jax.experimental import pallas as pl
from jax.experimental.pallas import tpu as pltpu

_LANE = 128          # TPU lane width (last-dim vreg size)
_NEG_BIG = -1e30     # bias for padded logit columns -> exp() underflows to 0


def _round_up(x, m):
    return (x + m - 1) // m * m


def _pad_to(a, shape, fill=0.0):
    pads = [(0, t - s) for s, t in zip(a.shape, shape)]
    return jnp.pad(a, pads, constant_values=fill)


def _num_tensorcores():
    """1 on v5e/v6e (single TC per chip), 2 on v7x. Best-effort detection."""
    try:
        kind = jax.devices()[0].device_kind.lower()
    except Exception:
        return 1
    return 2 if "v7" in kind else 1


def _policy_kernel(obs_ref, w1_ref, b1_ref, w2_ref, b2_ref, w3_ref, b3_ref,
                   out_ref, *, act_dim):
    # bf16 cast inside the kernel: cheap VPU op hidden under MXU/DMA,
    # no separate XLA convert pass over obs in HBM.
    x = obs_ref[...].astype(jnp.bfloat16)                       # [tb, obs_dim]

    # fc1 + ReLU  (bf16 MXU inputs, f32 accumulation; elementwise in f32)
    h1 = jnp.dot(x, w1_ref[...], preferred_element_type=jnp.float32)
    h1 = jnp.maximum(h1 + b1_ref[...], 0.0)                     # [tb, 128] f32

    # fc2 + ReLU
    h2 = jnp.dot(h1.astype(jnp.bfloat16), w2_ref[...],
                 preferred_element_type=jnp.float32)
    h2 = jnp.maximum(h2 + b2_ref[...], 0.0)                     # [tb, 128] f32

    # output layer; padded action columns carry a -1e30 bias
    logits = jnp.dot(h2.astype(jnp.bfloat16), w3_ref[...],
                     preferred_element_type=jnp.float32)
    logits = logits + b3_ref[...]                               # [tb, 128] f32

    # numerically stable softmax over the (lane-dense, padded) last dim;
    # padded columns contribute exp(-inf) = 0 to the denominator.
    m = jnp.max(logits, axis=-1, keepdims=True)
    e = jnp.exp(logits - m)
    denom = jnp.sum(e, axis=-1, keepdims=True)
    r = pl.reciprocal(denom, approx=True)                       # EUP slot (free)
    r = r * (2.0 - denom * r)                                   # one Newton step
    probs = e * r                                               # [tb, 128] f32

    # Store only the real action columns -> un-padded HBM writeback.
    out_ref[...] = probs[:, :act_dim].astype(out_ref.dtype)


def prepare_params(params):
    """One-time padding / casting of the PolicyNetwork parameters.

    params: dict with w1 [obs_dim, h0], b1 [h0] or [1, h0], w2 [h0, h1],
            b2 [h1] or [1, h1], w3 [h1, act_dim], b3 [act_dim] or [1, act_dim].
    Returns a dict of lane-padded, dtype-converted arrays (reuse across calls).
    """
    w1, w2, w3 = params["w1"], params["w2"], params["w3"]
    b1 = jnp.asarray(params["b1"]).reshape(1, -1)
    b2 = jnp.asarray(params["b2"]).reshape(1, -1)
    b3 = jnp.asarray(params["b3"]).reshape(1, -1)

    obs_dim, h0 = w1.shape
    h1 = w2.shape[1]
    act_dim = w3.shape[1]
    h0p = _round_up(h0, _LANE)
    h1p = _round_up(h1, _LANE)
    ap = _round_up(act_dim, _LANE)

    return {
        "w1": _pad_to(w1, (obs_dim, h0p)).astype(jnp.bfloat16),
        "b1": _pad_to(b1, (1, h0p)).astype(jnp.float32),
        "w2": _pad_to(w2, (h0p, h1p)).astype(jnp.bfloat16),
        "b2": _pad_to(b2, (1, h1p)).astype(jnp.float32),
        "w3": _pad_to(w3, (h1p, ap)).astype(jnp.bfloat16),
        # -1e30 fill kept here so padded logit columns can never gain mass.
        "b3": _pad_to(b3, (1, ap), fill=_NEG_BIG).astype(jnp.float32),
        "act_dim": act_dim,
    }


def policy_network_forward(obs, params, *, block_b=None):
    """PolicyNetwork forward pass. obs: [B, obs_dim] f32 -> probs [B, act_dim] f32.

    `params` may be raw (as from init_policy_params) or pre-prepared via
    prepare_params(); preparing once and reusing is the fast path.
    """
    if "act_dim" not in params:
        params = prepare_params(params)

    B, obs_dim = obs.shape
    act_dim = params["act_dim"]
    h0p = params["w1"].shape[1]
    h1p = params["w2"].shape[1]
    ap = params["w3"].shape[1]

    # --- batch tile selection (generation-aware) ------------------------------
    n_cores = _num_tensorcores()
    if block_b is None:
        if n_cores > 1:
            # Split the batch so every TensorCore gets at least one block.
            block_b = min(2048, _round_up(max(pl.cdiv(B, n_cores), 8), 8))
        else:
            # Single TC: the grid is a serial loop, so one big tile avoids
            # paying the ~0.35us per-step overhead. Cap keeps VMEM use small.
            block_b = min(2048, _round_up(max(B, 8), 8))
    assert block_b % 8 == 0, "block_b must be a multiple of 8 (f32 sublane)"

    B_pad = _round_up(B, block_b)
    grid = (B_pad // block_b,)

    obs_p = obs if B_pad == B else jnp.pad(obs, ((0, B_pad - B), (0, 0)))
    obs_p = obs_p.astype(jnp.float32)      # cast to bf16 happens in-kernel

    # Weights/biases: constant index_map -> VMEM-resident, single buffer.
    def resident(shape):
        return pl.BlockSpec(shape, lambda i: (0,) * len(shape),
                            pipeline_mode=pl.Buffered(1))

    # Only CORE_PARALLEL actually splits a grid axis across v7x's two TCs;
    # on single-TC chips the semantics make no measurable difference.
    if grid[0] > 1 and n_cores > 1 and hasattr(pltpu, "CORE_PARALLEL"):
        semantics = (pltpu.CORE_PARALLEL,)
    else:
        semantics = ("arbitrary",)

    # Advisory scheduling hint so XLA overlaps this tiny kernel correctly.
    weight_bytes = 2 * (obs_dim * h0p + h0p * h1p + h1p * ap) \
        + 4 * (h0p + h1p + ap)
    cost = pl.CostEstimate(
        flops=2 * B_pad * (obs_dim * h0p + h0p * h1p + h1p * ap),
        transcendentals=B_pad * ap,
        bytes_accessed=B_pad * obs_dim * 4 + B_pad * act_dim * 4 + weight_bytes,
    )

    out = pl.pallas_call(
        functools.partial(_policy_kernel, act_dim=act_dim),
        out_shape=jax.ShapeDtypeStruct((B_pad, act_dim), jnp.float32),
        grid_spec=pl.GridSpec(
            grid=grid,
            in_specs=[
                pl.BlockSpec((block_b, obs_dim), lambda i: (i, 0)),   # obs tile
                resident((obs_dim, h0p)),
                resident((1, h0p)),
                resident((h0p, h1p)),
                resident((1, h1p)),
                resident((h1p, ap)),
                resident((1, ap)),
            ],
            out_specs=pl.BlockSpec((block_b, act_dim), lambda i: (i, 0)),
        ),
        compiler_params=pltpu.CompilerParams(dimension_semantics=semantics),
        cost_estimate=cost,
    )(obs_p, params["w1"], params["b1"], params["w2"], params["b2"],
      params["w3"], params["b3"])

    return out if B_pad == B else out[:B]


def init_policy_params(key, obs_dim, act_dim, hidden_size=(64, 64)):
    """Deterministic init mimicking nn.Linear's U(-1/sqrt(fan_in), 1/sqrt(fan_in))."""
    h0, h1 = hidden_size
    keys = jax.random.split(key, 6)

    def linear(kw, kb, fan_in, fan_out):
        bound = 1.0 / jnp.sqrt(jnp.float32(fan_in))
        w = jax.random.uniform(kw, (fan_in, fan_out), jnp.float32, -bound, bound)
        b = jax.random.uniform(kb, (1, fan_out), jnp.float32, -bound, bound)
        return w, b

    w1, b1 = linear(keys[0], keys[1], obs_dim, h0)
    w2, b2 = linear(keys[2], keys[3], h0, h1)
    w3, b3 = linear(keys[4], keys[5], h1, act_dim)
    return {"w1": w1, "b1": b1, "w2": w2, "b2": b2, "w3": w3, "b3": b3}


def _reference_forward_f32(obs, p):
    x = jnp.maximum(obs @ p["w1"] + p["b1"], 0.0)
    x = jnp.maximum(x @ p["w2"] + p["b2"], 0.0)
    return jax.nn.softmax(x @ p["w3"] + p["b3"], axis=-1)


def _reference_forward_bf16(obs, p):
    # Same bf16-input / f32-accumulate arithmetic as the kernel.
    bf = lambda a: a.astype(jnp.bfloat16).astype(jnp.float32)
    x = jnp.maximum(bf(obs) @ bf(p["w1"]) + p["b1"], 0.0)
    x = jnp.maximum(bf(x) @ bf(p["w2"]) + p["b2"], 0.0)
    logits = bf(x) @ bf(p["w3"]) + p["b3"]
    return jax.nn.softmax(logits, axis=-1)


if __name__ == "__main__":
    key = jax.random.PRNGKey(0)
    k_obs, k_params = jax.random.split(key)

    batch, obs_dim, act_dim = 64, 16, 8
    hidden_size = (64, 64)

    obs = jax.random.normal(k_obs, (batch, obs_dim), jnp.float32)
    params = init_policy_params(k_params, obs_dim, act_dim, hidden_size)

    # One-time parameter prep (padding + bf16 cast), reused across calls.
    prepared = prepare_params(params)

    action_probs = jax.block_until_ready(policy_network_forward(obs, prepared))

    assert action_probs.shape == (batch, act_dim)

    ref_bf16 = _reference_forward_bf16(obs, params)
    ref_f32 = _reference_forward_f32(obs, params)
    assert jnp.allclose(action_probs, ref_bf16, atol=2e-4), \
        "mismatch vs bf16-matched reference"
    assert jnp.allclose(action_probs, ref_f32, atol=3e-2), \
        "mismatch vs f32 reference"
    assert jnp.allclose(jnp.sum(action_probs, axis=-1), 1.0, atol=1e-4), \
        "rows must sum to 1"

    print("KERNEL_OK")
</pallas_src>

<mosaic_0001>
module attributes {stable_mosaic.version = 11 : i64} {
  func.func @_policy_kernel(%arg0: i32, %arg1: memref<64x16xf32, #tpu.memory_space<vmem>>, %arg2: memref<16x128xbf16, #tpu.memory_space<vmem>>, %arg3: memref<1x128xf32, #tpu.memory_space<vmem>>, %arg4: memref<128x128xbf16, #tpu.memory_space<vmem>>, %arg5: memref<1x128xf32, #tpu.memory_space<vmem>>, %arg6: memref<128x128xbf16, #tpu.memory_space<vmem>>, %arg7: memref<1x128xf32, #tpu.memory_space<vmem>>, %arg8: memref<64x8xf32, #tpu.memory_space<vmem>>) attributes {dimension_semantics = [#tpu.dimension_semantics<arbitrary>], iteration_bounds = array<i64: 1>, scalar_prefetch = 0 : i64, scratch_operands = 0 : i64, tpu.core_type = #tpu.core_type<tc>, window_params = [{transform_indices = @transform_0, window_bounds = array<i64: 64, 16>}, {pipeline_mode = #tpu.pipeline_mode<synchronous>, transform_indices = @transform_1, window_bounds = array<i64: 16, 128>}, {pipeline_mode = #tpu.pipeline_mode<synchronous>, transform_indices = @transform_2, window_bounds = array<i64: 1, 128>}, {pipeline_mode = #tpu.pipeline_mode<synchronous>, transform_indices = @transform_3, window_bounds = array<i64: 128, 128>}, {pipeline_mode = #tpu.pipeline_mode<synchronous>, transform_indices = @transform_4, window_bounds = array<i64: 1, 128>}, {pipeline_mode = #tpu.pipeline_mode<synchronous>, transform_indices = @transform_5, window_bounds = array<i64: 128, 128>}, {pipeline_mode = #tpu.pipeline_mode<synchronous>, transform_indices = @transform_6, window_bounds = array<i64: 1, 128>}, {transform_indices = @transform_7, window_bounds = array<i64: 64, 8>}]} {
    %c0 = arith.constant 0 : index
    %c0_0 = arith.constant 0 : index
    %0 = vector.load %arg1[%c0, %c0_0] : memref<64x16xf32, #tpu.memory_space<vmem>>, vector<64x16xf32>
    %1 = arith.truncf %0 : vector<64x16xf32> to vector<64x16xbf16>
    %c0_1 = arith.constant 0 : index
    %c0_2 = arith.constant 0 : index
    %2 = vector.load %arg2[%c0_1, %c0_2] : memref<16x128xbf16, #tpu.memory_space<vmem>>, vector<16x128xbf16>
    %cst = arith.constant dense<0.000000e+00> : vector<64x128xf32>
    %3 = tpu.matmul %1, %2, %cst {dimension_numbers = #tpu.dot_dimension_numbers<[1], [0], [0], [1], [0, 0, 1, 1], [], []>} : vector<64x16xbf16>, vector<16x128xbf16>, vector<64x128xf32> -> vector<64x128xf32>
    %c0_3 = arith.constant 0 : index
    %c0_4 = arith.constant 0 : index
    %4 = vector.load %arg3[%c0_3, %c0_4] : memref<1x128xf32, #tpu.memory_space<vmem>>, vector<1x128xf32>
    %5 = vector.broadcast %4 : vector<1x128xf32> to vector<64x128xf32>
    %6 = arith.addf %3, %5 : vector<64x128xf32>
    %cst_5 = arith.constant 0.000000e+00 : f32
    %7 = vector.broadcast %cst_5 : f32 to vector<64x128xf32>
    %8 = arith.maximumf %6, %7 : vector<64x128xf32>
    %9 = arith.truncf %8 : vector<64x128xf32> to vector<64x128xbf16>
    %c0_6 = arith.constant 0 : index
    %c0_7 = arith.constant 0 : index
    %10 = vector.load %arg4[%c0_6, %c0_7] : memref<128x128xbf16, #tpu.memory_space<vmem>>, vector<128x128xbf16>
    %cst_8 = arith.constant dense<0.000000e+00> : vector<64x128xf32>
    %11 = tpu.matmul %9, %10, %cst_8 {dimension_numbers = #tpu.dot_dimension_numbers<[1], [0], [0], [1], [0, 0, 1, 1], [], []>} : vector<64x128xbf16>, vector<128x128xbf16>, vector<64x128xf32> -> vector<64x128xf32>
    %c0_9 = arith.constant 0 : index
    %c0_10 = arith.constant 0 : index
    %12 = vector.load %arg5[%c0_9, %c0_10] : memref<1x128xf32, #tpu.memory_space<vmem>>, vector<1x128xf32>
    %13 = vector.broadcast %12 : vector<1x128xf32> to vector<64x128xf32>
    %14 = arith.addf %11, %13 : vector<64x128xf32>
    %cst_11 = arith.constant 0.000000e+00 : f32
    %15 = vector.broadcast %cst_11 : f32 to vector<64x128xf32>
    %16 = arith.maximumf %14, %15 : vector<64x128xf32>
    %17 = arith.truncf %16 : vector<64x128xf32> to vector<64x128xbf16>
    %c0_12 = arith.constant 0 : index
    %c0_13 = arith.constant 0 : index
    %18 = vector.load %arg6[%c0_12, %c0_13] : memref<128x128xbf16, #tpu.memory_space<vmem>>, vector<128x128xbf16>
    %cst_14 = arith.constant dense<0.000000e+00> : vector<64x128xf32>
    %19 = tpu.matmul %17, %18, %cst_14 {dimension_numbers = #tpu.dot_dimension_numbers<[1], [0], [0], [1], [0, 0, 1, 1], [], []>} : vector<64x128xbf16>, vector<128x128xbf16>, vector<64x128xf32> -> vector<64x128xf32>
    %c0_15 = arith.constant 0 : index
    %c0_16 = arith.constant 0 : index
    %20 = vector.load %arg7[%c0_15, %c0_16] : memref<1x128xf32, #tpu.memory_space<vmem>>, vector<1x128xf32>
    %21 = vector.broadcast %20 : vector<1x128xf32> to vector<64x128xf32>
    %22 = arith.addf %19, %21 : vector<64x128xf32>
    %cst_17 = arith.constant dense<0xFF800000> : vector<64xf32>
    %23 = vector.multi_reduction <maximumf>, %22, %cst_17 [1] : vector<64x128xf32> to vector<64xf32>
    %24 = vector.shape_cast %23 : vector<64xf32> to vector<64x1xf32>
    %25 = vector.broadcast %24 : vector<64x1xf32> to vector<64x128xf32>
    %26 = arith.subf %22, %25 : vector<64x128xf32>
    %27 = math.exp %26 : vector<64x128xf32>
    %cst_18 = arith.constant dense<0.000000e+00> : vector<64xf32>
    %28 = vector.multi_reduction <add>, %27, %cst_18 [1] : vector<64x128xf32> to vector<64xf32>
    %29 = vector.shape_cast %28 : vector<64xf32> to vector<64x1xf32>
    %30 = tpu.reciprocal %29 {approx = true} : vector<64x1xf32> -> vector<64x1xf32>
    %31 = arith.mulf %29, %30 : vector<64x1xf32>
    %cst_19 = arith.constant 2.000000e+00 : f32
    %32 = vector.broadcast %cst_19 : f32 to vector<64x1xf32>
    %33 = arith.subf %32, %31 : vector<64x1xf32>
    %34 = arith.mulf %30, %33 : vector<64x1xf32>
    %35 = vector.broadcast %34 : vector<64x1xf32> to vector<64x128xf32>
    %36 = arith.mulf %27, %35 : vector<64x128xf32>
    %37 = vector.extract_strided_slice %36 {offsets = [0, 0], sizes = [64, 8], strides = [1, 1]} : vector<64x128xf32> to vector<64x8xf32>
    %c0_20 = arith.constant 0 : index
    %c0_21 = arith.constant 0 : index
    %38 = vector.load %arg8[%c0_20, %c0_21] : memref<64x8xf32, #tpu.memory_space<vmem>>, vector<64x8xf32>
    tpu.vector_store %arg8[%c0_20, %c0_21], %37 {strides = array<i32>} : memref<64x8xf32, #tpu.memory_space<vmem>>, vector<64x8xf32>,
    return
  }
  func.func @transform_0(%arg0: i32) -> (i32, i32) {
    %c0_i32 = arith.constant 0 : i32
    %c0_i32_0 = arith.constant 0 : i32
    return %arg0, %c0_i32 : i32, i32
  }
  func.func @transform_1(%arg0: i32) -> (i32, i32) {
    %c0_i32 = arith.constant 0 : i32
    %c0_i32_0 = arith.constant 0 : i32
    %c0_i32_1 = arith.constant 0 : i32
    return %c0_i32, %c0_i32_0 : i32, i32
  }
  func.func @transform_2(%arg0: i32) -> (i32, i32) {
    %c0_i32 = arith.constant 0 : i32
    %c0_i32_0 = arith.constant 0 : i32
    %c0_i32_1 = arith.constant 0 : i32
    return %c0_i32, %c0_i32_0 : i32, i32
  }
  func.func @transform_3(%arg0: i32) -> (i32, i32) {
    %c0_i32 = arith.constant 0 : i32
    %c0_i32_0 = arith.constant 0 : i32
    %c0_i32_1 = arith.constant 0 : i32
    return %c0_i32, %c0_i32_0 : i32, i32
  }
  func.func @transform_4(%arg0: i32) -> (i32, i32) {
    %c0_i32 = arith.constant 0 : i32
    %c0_i32_0 = arith.constant 0 : i32
    %c0_i32_1 = arith.constant 0 : i32
    return %c0_i32, %c0_i32_0 : i32, i32
  }
  func.func @transform_5(%arg0: i32) -> (i32, i32) {
    %c0_i32 = arith.constant 0 : i32
    %c0_i32_0 = arith.constant 0 : i32
    %c0_i32_1 = arith.constant 0 : i32
    return %c0_i32, %c0_i32_0 : i32, i32
  }
  func.func @transform_6(%arg0: i32) -> (i32, i32) {
    %c0_i32 = arith.constant 0 : i32
    %c0_i32_0 = arith.constant 0 : i32
    %c0_i32_1 = arith.constant 0 : i32
    return %c0_i32, %c0_i32_0 : i32, i32
  }
  func.func @transform_7(%arg0: i32) -> (i32, i32) {
    %c0_i32 = arith.constant 0 : i32
    %c0_i32_0 = arith.constant 0 : i32
    return %arg0, %c0_i32 : i32, i32
  }
}

</mosaic_0001>

<bundles_post_ra>
// kernel: tpu_custom_call.1
= control target key start
LH: loop header
LB: loop body
LE: loop exit
PB: predicated region body
PF: predicated region fallthrough
CT: control target
= control target key end

     0   :  { %12 = vsyncpa [#allocation3], 0  ;;  %s739_s24 = smov [#allocation2]   ;;  %s902_s0 = inlined_call_operand.vmem [shape: f32[64,16], index: 0, kind: input, shape index: {}]   ;;  %s903_s1 = inlined_call_operand.vmem [shape: bf16[16,128], index: 1, kind: input, shape index: {}]   ;;  %s904_s2 = inlined_call_operand.vmem [shape: f32[1,128], index: 2, kind: input, shape index: {}]   ;;  %s905_s3 = inlined_call_operand.vmem [shape: bf16[128,128], index: 3, kind: input, shape index: {}]   ;;  %s906_s4 = inlined_call_operand.vmem [shape: f32[1,128], index: 4, kind: input, shape index: {}]   ;;  %s907_s5 = inlined_call_operand.hbm [shape: bf16[128,128], index: 5, kind: input, shape index: {}]   ;;  %s908_s6 = inlined_call_operand.vmem [shape: f32[1,128], index: 6, kind: input, shape index: {}]   ;;  %s909_s7 = inlined_call_operand.vmem [shape: f32[64,8], index: 7, kind: output, shape index: {}]  }
   0x1   :  { %s28_s25 = sshll.u32 %s739_s24, 4  ;;  %s715_s28 = scalar_lea.hbm %s907_s5, 1024  ;;  %s29_s25 = int_to_ptr.vmem [resolvable:$true] %s28_s25 }
   0x2   :  { %p716_p0 = scmp.ne.s32.totalorder %s907_s5, %s715_s28  ;;  %p719_p1 = scmp.lt.u32.totalorder %s715_s28, %s907_s5 }
   0x4   :  { %p721_p2 = pnand %p719_p1, %p716_p0 }
   0x6   :  { %724 = shalt.err (!%p721_p2)
}
   0x7   :  { %s725_s10 = scalar_lea.vmem %s29_s25, 1024  ;;  %p730_p4 = scmp.lt.s32.totalorder %s29_s25, %s29_s25 }
   0x8   :  { %p726_p3 = scmp.ne.s32.totalorder %s29_s25, %s725_s10  ;;  %p731_p5 = scmp.lt.s32.totalorder %s725_s10, %s725_s10 }
   0xa   :  { %p732_p6 = por %p731_p5, %p730_p4 }
   0xc   :  { %p733_p7 = pnand %p732_p6, %p726_p3 }
   0xe   :  { %736 = shalt.err (!%p733_p7)
}
   0xf   :  { %s740_s11 = smov 64   ;;  %s741_s12 = smov 4  }
  0x10   :  { %34 = dma.hbm_to_vmem [thread:$0]  %s907_s5, 1024, %s29_s25, [#allocation3], %s740_s11, %s740_s11, %s741_s12  }
  0x11   :  { %737 = dma.done.wait [#allocation3], 1024  }
  0x12   :  { %738 = vsyncadd [#allocation3], 4294966272  ;;  %v666_v0 = vld [vmem:[%s903_s1] sm:$0xff]   ;;  %v42_v2 = vld [vmem:[%s902_s0 + $0x8] sm:$0xff]  ;;  %vm68_vm0 = vcmask 130048   ;;  %vm538_vm1 = vcmask 64512  }
  0x13   :  { %v41_v1 = vld [vmem:[%s902_s0] sm:$0xff]  ;;  %v43_v3 = vld [vmem:[%s902_s0 + $0x10] sm:$0xff]  ;;  %605 = vmatprep.subr.bf16.mxu0 %v666_v0  ;;  %v44_v5 = vld [vmem:[%s902_s0 + $0x18] sm:$0xff] }
  0x14   :  { %v49_v4 = vpack.c.bf16 %v42_v2, %v41_v1  ;;  %v45_v6 = vld [vmem:[%s902_s0 + $0x20] sm:$0xff]  ;;  %v46_v7 = vld [vmem:[%s902_s0 + $0x28] sm:$0xff]  ;;  %606 = vmatpush3.bf16.msra.mxu0 %v666_v0  ;;  %v50_v8 = vpack.c.bf16 %v44_v5, %v43_v3  ;;  %v47_v12 = vld [vmem:[%s902_s0 + $0x30] sm:$0xff] }
  0x15   :  { %v51_v9 = vpack.c.bf16 %v46_v7, %v45_v6  ;;  %v667_v10 = vld [vmem:[%s905_s3] sm:$0xff]   ;;  %v668_v11 = vld [vmem:[%s905_s3 + $0x8] sm:$0xff]   ;;  %v48_v13 = vld [vmem:[%s902_s0 + $0x38] sm:$0xff] }
  0x16   :  { %607 = vmatprep.mubr.msk.bf16.mxu0 %vm68_vm0, %v49_v4  ;;  %615 = vmatprep.subr.bf16.mxu1 %v667_v10  ;;  %v669_v14 = vld [vmem:[%s905_s3 + $0x10] sm:$0xff]   ;;  %v52_v15 = vpack.c.bf16 %v48_v13, %v47_v12  ;;  %v670_v16 = vld [vmem:[%s905_s3 + $0x18] sm:$0xff]   ;;  %v671_v17 = vld [vmem:[%s905_s3 + $0x20] sm:$0xff]  }
  0x17   :  { %608 = vmatmul.mubr.msk.bf16.vlgmr.msra.gmra.mrb[0].mxu0 %vm68_vm0, %v50_v8  ;;  %616 = vmatpush3.bf16.msra.mxu1 %v667_v10  ;;  %v672_v18 = vld [vmem:[%s905_s3 + $0x28] sm:$0xff]   ;;  %v673_v19 = vld [vmem:[%s905_s3 + $0x30] sm:$0xff]   ;;  %v674_v20 = vld [vmem:[%s905_s3 + $0x38] sm:$0xff]  }
  0x18   :  { %611 = vmatprep.mubr.msk.bf16.mxu0 %vm68_vm0, %v51_v9  ;;  %617 = vmatprep.subr.bf16.mxu1 %v668_v11  ;;  %v675_v21 = vld [vmem:[#allocation2] sm:$0xff]   ;;  %v676_v22 = vld [vmem:[#allocation2 + $0x8] sm:$0xff]   ;;  %v677_v23 = vld [vmem:[#allocation2 + $0x10] sm:$0xff]  }
  0x19   :  { %639 = vmatprep.subr.bf16.mxu0 %v675_v21  ;;  %v678_v24 = vld [vmem:[#allocation2 + $0x18] sm:$0xff]   ;;  %v679_v25 = vld [vmem:[#allocation2 + $0x20] sm:$0xff]   ;;  %v680_v26 = vld [vmem:[#allocation2 + $0x28] sm:$0xff]  }
  0x1a   :  { %640 = vmatpush3.bf16.msra.mxu0 %v675_v21  ;;  %v552_v27 = vld [vmem:[%s904_s2] ss:$0 sm:$0xff]  ;;  %v681_v56 = vld [vmem:[#allocation2 + $0x30] sm:$0xff]   ;;  %v682_v57 = vld [vmem:[#allocation2 + $0x38] sm:$0xff]  }
  0x1b   :  { %618 = vmatpush3.bf16.msra.mxu1 %v668_v11  ;;  %641 = vmatprep.subr.bf16.mxu0 %v676_v22  ;;  %v558_v58 = vld [vmem:[%s906_s4] ss:$0 sm:$0xff] }
  0x1c   :  { %619 = vmatprep.subr.bf16.mxu1 %v669_v14 }
  0x1e   :  { %642 = vmatpush3.bf16.msra.mxu0 %v676_v22 }
  0x1f   :  { %612 = vmatmul.mubr.msk.bf16.gmra.mrb[4].mxu0 %vm68_vm0, %v52_v15  ;;  %620 = vmatpush3.bf16.msra.mxu1 %v669_v14 }
  0x20   :  { %621 = vmatprep.subr.bf16.mxu1 %v670_v16  ;;  %643 = vmatprep.subr.bf16.mxu0 %v677_v23 }
  0x22   :  { %644 = vmatpush3.bf16.msra.mxu0 %v677_v23  ;;  %v567_v23 = vld [vmem:[%s908_s6] ss:$0 sm:$0xff] }
  0x23   :  { %622 = vmatpush3.bf16.msra.mxu1 %v670_v16  ;;  %645 = vmatprep.subr.bf16.mxu0 %v678_v24 }
  0x24   :  { %623 = vmatprep.subr.bf16.mxu1 %v671_v17 }
  0x26   :  { %646 = vmatpush3.bf16.msra.mxu0 %v678_v24 }
  0x27   :  { %624 = vmatpush3.bf16.msra.mxu1 %v671_v17  ;;  %647 = vmatprep.subr.bf16.mxu0 %v679_v25 }
  0x28   :  { %625 = vmatprep.subr.bf16.mxu1 %v672_v18 }
  0x2a   :  { %648 = vmatpush3.bf16.msra.mxu0 %v679_v25 }
  0x2b   :  { %626 = vmatpush3.bf16.msra.mxu1 %v672_v18  ;;  %649 = vmatprep.subr.bf16.mxu0 %v680_v26 }
  0x2c   :  { %627 = vmatprep.subr.bf16.mxu1 %v673_v19 }
  0x2e   :  { %650 = vmatpush3.bf16.msra.mxu0 %v680_v26 }
  0x2f   :  { %628 = vmatpush3.bf16.msra.mxu1 %v673_v19  ;;  %651 = vmatprep.subr.bf16.mxu0 %v681_v56 }
  0x30   :  { %629 = vmatprep.subr.bf16.mxu1 %v674_v20 }
  0x32   :  { %652 = vmatpush3.bf16.msra.mxu0 %v681_v56 }
  0x33   :  { %630 = vmatpush3.bf16.msra.mxu1 %v674_v20  ;;  %653 = vmatprep.subr.bf16.mxu0 %v682_v57 }
  0x36   :  { %654 = vmatpush3.bf16.msra.mxu0 %v682_v57 }
  0xea   :  { %v609_v28 = vpop.f32.mrb[0].mxu0 }
  0xeb   :  { %v124_v29 = vadd.f32 %v609_v28, %v552_v27  ;;  %v115_v30 = vpop.f32.mrb[1].mxu0 }
  0xec   :  { %v116_v31 = vadd.f32 %v552_v27, %v115_v30  ;;  %v610_v32 = vpop.f32.mrb[2].mxu0 }
  0xed   :  { %v127_v33 = vadd.f32 %v610_v32, %v552_v27  ;;  %v118_v34 = vpop.f32.mrb[3].mxu0  ;;  %v148_v36 = vmax.f32 %v124_v29, 0.0 }
  0xee   :  { %v119_v35 = vadd.f32 %v552_v27, %v118_v34  ;;  %v146_v38 = vmax.f32 %v116_v31, 0.0 }
  0xef   :  { %v149_v37 = vmax.f32 %v127_v33, 0.0 }
  0xf0   :  { %v147_v39 = vmax.f32 %v119_v35, 0.0 }
  0xf1   :  { %v155_v40 = vpack.c.bf16 %v149_v37, %v148_v36 }
  0xf2   :  { %v613_v41 = vpop.f32.mrb[4].mxu0  ;;  %v154_v42 = vpack.c.bf16 %v147_v39, %v146_v38 }
  0xf3   :  { %v140_v43 = vadd.f32 %v613_v41, %v552_v27  ;;  %v131_v44 = vpop.f32.mrb[5].mxu0 }
  0xf4   :  { %v132_v45 = vadd.f32 %v552_v27, %v131_v44  ;;  %v614_v46 = vpop.f32.mrb[6].mxu0  ;;  %631 = vmatprep.mubr.bf16.mxu1 %v154_v42 }
  0xf5   :  { %v152_v47 = vmax.f32 %v140_v43, 0.0  ;;  %v143_v48 = vadd.f32 %v614_v46, %v552_v27  ;;  %v134_v49 = vpop.f32.mrb[7].mxu0  ;;  %632 = vmatmul.mubr.bf16.vlgmr.msra.gmra.mrb[0].mxu1 %v155_v40 }
  0xf6   :  { %v135_v50 = vadd.f32 %v552_v27, %v134_v49  ;;  %v150_v52 = vmax.f32 %v132_v45, 0.0 }
  0xf7   :  { %v153_v51 = vmax.f32 %v143_v48, 0.0 }
  0xf8   :  { %v151_v53 = vmax.f32 %v135_v50, 0.0 }
  0xf9   :  { %v157_v54 = vpack.c.bf16 %v153_v51, %v152_v47 }
  0xfa   :  { %v156_v55 = vpack.c.bf16 %v151_v53, %v150_v52 }
  0xfc   :  { %635 = vmatprep.mubr.bf16.mxu1 %v156_v55 }
  0xfd   :  { %636 = vmatmul.mubr.bf16.gmra.mrb[4].mxu1 %v157_v54 }
 0x1c8   :  { %v633_v59 = vpop.f32.mrb[0].mxu1 }
 0x1c9   :  { %v272_v60 = vadd.f32 %v633_v59, %v558_v58  ;;  %v263_v61 = vpop.f32.mrb[1].mxu1 }
 0x1ca   :  { %v264_v62 = vadd.f32 %v558_v58, %v263_v61  ;;  %v634_v63 = vpop.f32.mrb[2].mxu1 }
 0x1cb   :  { %v275_v0 = vadd.f32 %v634_v63, %v558_v58  ;;  %v266_v1 = vpop.f32.mrb[3].mxu1  ;;  %v296_v3 = vmax.f32 %v272_v60, 0.0 }
 0x1cc   :  { %v267_v2 = vadd.f32 %v558_v58, %v266_v1  ;;  %v294_v5 = vmax.f32 %v264_v62, 0.0 }
 0x1cd   :  { %v297_v4 = vmax.f32 %v275_v0, 0.0 }
 0x1ce   :  { %v295_v6 = vmax.f32 %v267_v2, 0.0 }
 0x1cf   :  { %v303_v7 = vpack.c.bf16 %v297_v4, %v296_v3 }
 0x1d0   :  { %v302_v8 = vpack.c.bf16 %v295_v6, %v294_v5  ;;  %v637_v9 = vpop.f32.mrb[4].mxu1 }
 0x1d1   :  { %v288_v10 = vadd.f32 %v637_v9, %v558_v58  ;;  %v279_v11 = vpop.f32.mrb[5].mxu1 }
 0x1d2   :  { %v280_v12 = vadd.f32 %v558_v58, %v279_v11  ;;  %v638_v13 = vpop.f32.mrb[6].mxu1  ;;  %655 = vmatprep.mubr.bf16.mxu0 %v302_v8 }
 0x1d3   :  { %v291_v14 = vadd.f32 %v638_v13, %v558_v58  ;;  %v282_v15 = vpop.f32.mrb[7].mxu1  ;;  %656 = vmatmul.mubr.bf16.vlgmr.msra.gmra.mrb[8].mxu0 %v303_v7  ;;  %v300_v17 = vmax.f32 %v288_v10, 0.0 }
 0x1d4   :  { %v283_v16 = vadd.f32 %v558_v58, %v282_v15  ;;  %v298_v19 = vmax.f32 %v280_v12, 0.0 }
 0x1d5   :  { %v301_v18 = vmax.f32 %v291_v14, 0.0 }
 0x1d6   :  { %v299_v20 = vmax.f32 %v283_v16, 0.0 }
 0x1d7   :  { %v305_v21 = vpack.c.bf16 %v301_v18, %v300_v17 }
 0x1d8   :  { %v304_v22 = vpack.c.bf16 %v299_v20, %v298_v19 }
 0x1da   :  { %659 = vmatprep.mubr.bf16.mxu0 %v304_v22 }
 0x1db   :  { %660 = vmatmul.mubr.bf16.gmra.mrb[12].mxu0 %v305_v21 }
 0x2a6   :  { %v657_v24 = vpop.f32.mrb[8].mxu0 }
 0x2a7   :  { %v420_v25 = vadd.f32 %v657_v24, %v567_v23  ;;  %v411_v26 = vpop.f32.mrb[9].mxu0 }
 0x2a8   :  { %v412_v27 = vadd.f32 %v567_v23, %v411_v26  ;;  %v658_v28 = vpop.f32.mrb[10].mxu0 }
 0x2a9   :  { %446 = vmax.xlane.f32.xlu1 %v420_v25  ;;  %v414_v29 = vpop.f32.mrb[11].mxu0  ;;  %v423_v30 = vadd.f32 %v658_v28, %v567_v23 }
 0x2aa   :  { %442 = vmax.xlane.f32.xlu0 %v412_v27  ;;  %v415_v31 = vadd.f32 %v567_v23, %v414_v29 }
 0x2ad   :  { %448 = vmax.xlane.f32.xlu1 %v423_v30 }
 0x2ae   :  { %v661_v32 = vpop.f32.mrb[12].mxu0  ;;  %444 = vmax.xlane.f32.xlu0 %v415_v31 }
 0x2af   :  { %v427_v33 = vpop.f32.mrb[13].mxu0  ;;  %v436_v38 = vadd.f32 %v661_v32, %v567_v23 }
 0x2b0   :  { %v428_v34 = vadd.f32 %v567_v23, %v427_v33  ;;  %v662_v35 = vpop.f32.mrb[14].mxu0 }
 0x2b1   :  { %v430_v36 = vpop.f32.mrb[15].mxu0  ;;  %v439_v39 = vadd.f32 %v662_v35, %v567_v23 }
 0x2b2   :  { %v431_v37 = vadd.f32 %v567_v23, %v430_v36  ;;  %450 = vmax.xlane.f32.xlu0 %v428_v34 }
 0x2b4   :  { %452 = vmax.xlane.f32.xlu1 %v431_v37 }
 0x2b6   :  { %454 = vmax.xlane.f32.xlu0 %v436_v38 }
 0x2b8   :  { %456 = vmax.xlane.f32.xlu1 %v439_v39 }
 0x336   :  { %v447_v40 = vpop.xlane.xlu1 %446 }
 0x337   :  { %v460_v41 = vsub.f32 %v420_v25, %v447_v40  ;;  %v443_v42 = vpop.xlane.xlu0 %442 }
 0x338   :  { %v458_v43 = vsub.f32 %v412_v27, %v443_v42 }
 0x339   :  { %v470_v44 = vmul.f32 1.442695, %v460_v41 }
 0x33a   :  { %v466_v45 = vmul.f32 1.442695, %v458_v43  ;;  %v449_v46 = vpop.xlane.xlu1 %448 }
 0x33b   :  { %683 = vpow2.f32 %v470_v44  ;;  %v461_v47 = vsub.f32 %v423_v30, %v449_v46  ;;  %v445_v48 = vpop.xlane.xlu0 %444 }
 0x33c   :  { %v459_v49 = vsub.f32 %v415_v31, %v445_v48  ;;  %685 = vpow2.f32 %v466_v45 }
 0x33d   :  { %v472_v50 = vmul.f32 1.442695, %v461_v47 }
 0x33e   :  { %v468_v51 = vmul.f32 1.442695, %v459_v49 }
 0x33f   :  { %687 = vpow2.f32 %v472_v50  ;;  %v451_v52 = vpop.xlane.xlu0 %450 }
 0x340   :  { %v462_v53 = vsub.f32 %v428_v34, %v451_v52  ;;  %689 = vpow2.f32 %v468_v51 }
 0x341   :  { %v453_v54 = vpop.xlane.xlu1 %452 }
 0x342   :  { %v474_v55 = vmul.f32 1.442695, %v462_v53  ;;  %v463_v56 = vsub.f32 %v431_v37, %v453_v54 }
 0x343   :  { %v455_v57 = vpop.xlane.xlu0 %454 }
 0x344   :  { %691 = vpow2.f32 %v474_v55  ;;  %v476_v58 = vmul.f32 1.442695, %v463_v56  ;;  %v464_v59 = vsub.f32 %v436_v38, %v455_v57 }
 0x345   :  { %v684_v60 = vpop.eup %683  ;;  %v457_v61 = vpop.xlane.xlu1 %456 }
 0x346   :  { %693 = vpow2.f32 %v476_v58  ;;  %v478_v62 = vmul.f32 1.442695, %v464_v59  ;;  %v465_v63 = vsub.f32 %v439_v39, %v457_v61  ;;  %486 = vadd.xlane.f32.xlu0 %v684_v60  ;;  %v686_v0 = vpop.eup %685 }
 0x348   :  { %695 = vpow2.f32 %v478_v62  ;;  %v480_v1 = vmul.f32 1.442695, %v465_v63 }
 0x349   :  { %v688_v2 = vpop.eup %687 }
 0x34a   :  { %697 = vpow2.f32 %v480_v1  ;;  %488 = vadd.xlane.f32.xlu1 %v688_v2  ;;  %482 = vadd.xlane.f32.xlu0 %v686_v0  ;;  %v690_v3 = vpop.eup %689 }
 0x34e   :  { %v692_v4 = vpop.eup %691  ;;  %484 = vadd.xlane.f32.xlu1 %v690_v3 }
 0x34f   :  { %490 = vadd.xlane.f32.xlu0 %v692_v4 }
 0x350   :  { %v858_v5 = vpop.eup %693 }
 0x352   :  { %v860_v6 = vpop.eup %695  ;;  %492 = vadd.xlane.f32.xlu1 %v858_v5 }
 0x353   :  { %494 = vadd.xlane.f32.xlu0 %v860_v6 }
 0x354   :  { %v864_v7 = vpop.eup %697 }
 0x356   :  { %496 = vadd.xlane.f32.xlu1 %v864_v7 }
 0x3d3   :  { %v487_v8 = vpop.xlane.xlu0 %486 }
 0x3d4   :  { %699 = vrcp.f32 %v487_v8 }
 0x3d7   :  { %v489_v9 = vpop.xlane.xlu1 %488  ;;  %v483_v10 = vpop.xlane.xlu0 %482 }
 0x3d8   :  { %701 = vrcp.f32 %v489_v9 }
 0x3d9   :  { %703 = vrcp.f32 %v483_v10 }
 0x3db   :  { %v485_v11 = vpop.xlane.xlu1 %484 }
 0x3dc   :  { %705 = vrcp.f32 %v485_v11  ;;  %v491_v12 = vpop.xlane.xlu0 %490 }
 0x3dd   :  { %707 = vrcp.f32 %v491_v12 }
 0x3de   :  { %v700_v13 = vpop.eup %699 }
 0x3df   :  { %v508_v14 = vmul.f32 %v700_v13, %v487_v8  ;;  %v493_v15 = vpop.xlane.xlu1 %492 }
 0x3e0   :  { %709 = vrcp.f32 %v493_v15  ;;  %v495_v16 = vpop.xlane.xlu0 %494 }
 0x3e1   :  { %v516_v17 = vsub.f32 2.0, %v508_v14  ;;  %711 = vrcp.f32 %v495_v16 }
 0x3e2   :  { %v702_v18 = vpop.eup %701 }
 0x3e3   :  { %v704_v19 = vpop.eup %703  ;;  %v524_v20 = vmul.f32 %v700_v13, %v516_v17  ;;  %v509_v21 = vmul.f32 %v702_v18, %v489_v9  ;;  %v497_v22 = vpop.xlane.xlu1 %496 }
 0x3e4   :  { %v506_v23 = vmul.f32 %v704_v19, %v483_v10  ;;  %713 = vrcp.f32 %v497_v22 }
 0x3e5   :  { %v532_v24 = vmul.f32 %v684_v60, %v524_v20  ;;  %v517_v25 = vsub.f32 2.0, %v509_v21 }
 0x3e6   :  { %v706_v26 = vpop.eup %705  ;;  %v514_v27 = vsub.f32 2.0, %v506_v23 }
 0x3e7   :  { %v708_v28 = vpop.eup %707  ;;  %541 = vst.msk [vmem:[%s909_s7 + $0x10] sm:$0xff] %vm538_vm1, %v532_v24  ;;  %v525_v29 = vmul.f32 %v702_v18, %v517_v25  ;;  %v507_v30 = vmul.f32 %v706_v26, %v485_v11 }
 0x3e8   :  { %v522_v31 = vmul.f32 %v704_v19, %v514_v27  ;;  %v510_v32 = vmul.f32 %v708_v28, %v491_v12 }
 0x3e9   :  { %v533_v33 = vmul.f32 %v688_v2, %v525_v29  ;;  %v515_v34 = vsub.f32 2.0, %v507_v30 }
 0x3ea   :  { %v710_v35 = vpop.eup %709  ;;  %v530_v36 = vmul.f32 %v686_v0, %v522_v31  ;;  %v518_v37 = vsub.f32 2.0, %v510_v32 }
 0x3eb   :  { %v712_v38 = vpop.eup %711  ;;  %542 = vst.msk [vmem:[%s909_s7 + $0x18] sm:$0xff] %vm538_vm1, %v533_v33  ;;  %v523_v39 = vmul.f32 %v706_v26, %v515_v34  ;;  %v511_v40 = vmul.f32 %v710_v35, %v493_v15 }
 0x3ec   :  { %539 = vst.msk [vmem:[%s909_s7] sm:$0xff] %vm538_vm1, %v530_v36  ;;  %v526_v41 = vmul.f32 %v708_v28, %v518_v37  ;;  %v512_v42 = vmul.f32 %v712_v38, %v495_v16 }
 0x3ed   :  { %v531_v43 = vmul.f32 %v690_v3, %v523_v39  ;;  %v519_v44 = vsub.f32 2.0, %v511_v40 }
 0x3ee   :  { %v714_v45 = vpop.eup %713  ;;  %v534_v46 = vmul.f32 %v692_v4, %v526_v41  ;;  %v520_v47 = vsub.f32 2.0, %v512_v42 }
 0x3ef   :  { %540 = vst.msk [vmem:[%s909_s7 + $0x8] sm:$0xff] %vm538_vm1, %v531_v43  ;;  %v527_v48 = vmul.f32 %v710_v35, %v519_v44  ;;  %v513_v49 = vmul.f32 %v714_v45, %v497_v22 }
 0x3f0   :  { %543 = vst.msk [vmem:[%s909_s7 + $0x20] sm:$0xff] %vm538_vm1, %v534_v46  ;;  %v528_v50 = vmul.f32 %v712_v38, %v520_v47 }
 0x3f1   :  { %v535_v51 = vmul.f32 %v858_v5, %v527_v48  ;;  %v521_v52 = vsub.f32 2.0, %v513_v49 }
 0x3f2   :  { %v536_v53 = vmul.f32 %v860_v6, %v528_v50 }
 0x3f3   :  { %544 = vst.msk [vmem:[%s909_s7 + $0x28] sm:$0xff] %vm538_vm1, %v535_v51  ;;  %v529_v54 = vmul.f32 %v714_v45, %v521_v52 }
 0x3f4   :  { %545 = vst.msk [vmem:[%s909_s7 + $0x30] sm:$0xff] %vm538_vm1, %v536_v53 }
 0x3f5   :  { %v537_v55 = vmul.f32 %v864_v7, %v529_v54 }
 0x3f7   :  { %546 = vst.msk [vmem:[%s909_s7 + $0x38] sm:$0xff] %vm538_vm1, %v537_v55 }
 0x3f8   :  { %551 = vsyncpa [#allocation3], 1 }

</bundles_post_ra>
